<compile_context>
chip_gen: v7x
topology: tpu7x:2x2x1
jax: 0.10.0
libtpu: 0.0.40
codegen_flags: <defaults>
</compile_context>

<pallas_src>
import jax
import jax.numpy as jnp
from jax.experimental import pallas as pl
from jax.experimental.pallas import tpu as pltpu


def _attention_pool_kernel(x_ref, w_ref, o_ref):
    # x_ref: (Bt, L, D) block   w_ref: (1, D)   o_ref: (Bt, D)
    x = x_ref[...]                                   # keep input dtype (bf16 stays bf16)
    w = w_ref[...].astype(jnp.float32)               # (1, D)

    # scores[b, l] = sum_d x[b, l, d] * w[d]  -> lane-dense (Bt, L)
    scores = jnp.sum(x.astype(jnp.float32) * w[None, :, :], axis=-1)      # (Bt, L)

    # Softmax over L (now the last / lane axis): cheap lane reduces.
    # (Linear bias omitted: softmax over L is shift-invariant.)
    m = jnp.max(scores, axis=-1, keepdims=True)                           # (Bt, 1)
    e = jnp.exp(scores - m)                                               # (Bt, L) unnormalized
    denom = jnp.sum(e, axis=-1, keepdims=True)                            # (Bt, 1)

    # Weighted sum over L on the MXU (flash-attention style batched matmul):
    #   pooled_raw[b, d] = sum_l e[b, l] * x[b, l, d]
    e3 = e[:, None, :].astype(x.dtype)                                    # (Bt, 1, L)
    pooled_raw = jnp.einsum(
        "bql,bld->bqd", e3, x, preferred_element_type=jnp.float32
    )[:, 0, :]                                                            # (Bt, D)

    # Deferred normalization: scale D values per row; approx reciprocal -> EUP.
    pooled = pooled_raw * pl.reciprocal(denom, approx=True)               # (Bt, D)
    o_ref[...] = pooled.astype(o_ref.dtype)


def attention_pool(x, weight, bias=None, *, batch_tile=8):
    """x: (B, L, D); weight: (1, D) (nn.Linear(d_model, 1).weight); bias ignored
    (softmax over L is shift-invariant). Returns (B, D)."""
    del bias  # mathematically a no-op for this module's forward
    B, L, D = x.shape
    Bt = int(batch_tile)
    B_pad = ((B + Bt - 1) // Bt) * Bt
    if B_pad != B:
        # Zero rows give uniform softmax weights over zeros -> pooled zeros; sliced off below.
        x = jnp.pad(x, ((0, B_pad - B), (0, 0), (0, 0)))

    w_row = weight.reshape(1, D).astype(jnp.float32)                      # lane-dense (1, D)

    out = pl.pallas_call(
        _attention_pool_kernel,
        out_shape=jax.ShapeDtypeStruct((B_pad, D), x.dtype),
        grid_spec=pltpu.PrefetchScalarGridSpec(
            num_scalar_prefetch=0,
            grid=(B_pad // Bt,),
            in_specs=[
                pl.BlockSpec((Bt, L, D), lambda b: (b, 0, 0)),            # batch-tiled x slab
                pl.BlockSpec((1, D), lambda b: (0, 0)),                   # attention weight row
            ],
            out_specs=pl.BlockSpec((Bt, D), lambda b: (b, 0)),            # sublane-dense output
        ),
        compiler_params=pltpu.CompilerParams(
            dimension_semantics=("parallel",),
        ),
    )(x, w_row)
    return out[:B]


def attention_pool_ref(x, weight, bias):
    scores = jnp.einsum("bld,od->blo", x, weight) + bias                  # (B, L, 1)
    weights = jax.nn.softmax(scores, axis=1)
    return jnp.sum(x * weights, axis=1)                                   # (B, D)


if __name__ == "__main__":
    key = jax.random.PRNGKey(0)
    kx, kw, kb, kx2 = jax.random.split(key, 4)

    B, L, D = 16, 16, 32                                                  # batch, seq, d_model
    x = jax.random.normal(kx, (B, L, D), dtype=jnp.float32)

    # Deterministic Linear(d_model, 1) params (synthetic init).
    bound = 1.0 / (D ** 0.5)
    weight = jax.random.uniform(kw, (1, D), minval=-bound, maxval=bound,
                                dtype=jnp.float32)
    bias = jax.random.uniform(kb, (1,), minval=-bound, maxval=bound,
                              dtype=jnp.float32)

    # Tolerance loosened for approx (EUP) reciprocal in the normalization
    # (~1e-3-level relative effect at most, per review).
    out = jax.block_until_ready(attention_pool(x, weight, bias))
    ref = attention_pool_ref(x, weight, bias)
    assert out.shape == (B, D)
    assert jnp.allclose(out, ref, atol=2e-3, rtol=2e-3), "mismatch vs reference"

    # Ragged batch (B=3) exercises the pad-to-batch-tile path.
    x2 = jax.random.normal(kx2, (3, L, D), dtype=jnp.float32)
    out2 = jax.block_until_ready(attention_pool(x2, weight, bias))
    ref2 = attention_pool_ref(x2, weight, bias)
    assert out2.shape == (3, D)
    assert jnp.allclose(out2, ref2, atol=2e-3, rtol=2e-3), "mismatch vs reference (padded)"

    print("KERNEL_OK")
</pallas_src>

<mosaic_0001>
module attributes {stable_mosaic.version = 11 : i64} {
  func.func @_attention_pool_kernel(%arg0: i32, %arg1: memref<8x16x32xf32, #tpu.memory_space<vmem>>, %arg2: memref<1x32xf32, #tpu.memory_space<vmem>>, %arg3: memref<8x32xf32, #tpu.memory_space<vmem>>) attributes {dimension_semantics = [#tpu.dimension_semantics<parallel>], iteration_bounds = array<i64: 2>, scalar_prefetch = 0 : i64, scratch_operands = 0 : i64, tpu.core_type = #tpu.core_type<tc>, window_params = [{transform_indices = @transform_0, window_bounds = array<i64: 8, 16, 32>}, {pipeline_mode = #tpu.pipeline_mode<synchronous>, transform_indices = @transform_1, window_bounds = array<i64: 1, 32>}, {transform_indices = @transform_2, window_bounds = array<i64: 8, 32>}]} {
    %c0 = arith.constant 0 : index
    %c0_0 = arith.constant 0 : index
    %c0_1 = arith.constant 0 : index
    %0 = vector.load %arg1[%c0, %c0_0, %c0_1] : memref<8x16x32xf32, #tpu.memory_space<vmem>>, vector<8x16x32xf32>
    %c0_2 = arith.constant 0 : index
    %c0_3 = arith.constant 0 : index
    %1 = vector.load %arg2[%c0_2, %c0_3] : memref<1x32xf32, #tpu.memory_space<vmem>>, vector<1x32xf32>
    %2 = vector.shape_cast %1 : vector<1x32xf32> to vector<1x1x32xf32>
    %3 = vector.broadcast %2 : vector<1x1x32xf32> to vector<8x16x32xf32>
    %4 = arith.mulf %0, %3 : vector<8x16x32xf32>
    %cst = arith.constant dense<0.000000e+00> : vector<8x16xf32>
    %5 = vector.multi_reduction <add>, %4, %cst [2] : vector<8x16x32xf32> to vector<8x16xf32>
    %cst_4 = arith.constant dense<0xFF800000> : vector<8xf32>
    %6 = vector.multi_reduction <maximumf>, %5, %cst_4 [1] : vector<8x16xf32> to vector<8xf32>
    %7 = vector.shape_cast %6 : vector<8xf32> to vector<8x1xf32>
    %8 = vector.broadcast %7 : vector<8x1xf32> to vector<8x16xf32>
    %9 = arith.subf %5, %8 : vector<8x16xf32>
    %10 = math.exp %9 : vector<8x16xf32>
    %cst_5 = arith.constant dense<0.000000e+00> : vector<8xf32>
    %11 = vector.multi_reduction <add>, %10, %cst_5 [1] : vector<8x16xf32> to vector<8xf32>
    %12 = vector.shape_cast %11 : vector<8xf32> to vector<8x1xf32>
    %13 = vector.shape_cast %10 : vector<8x16xf32> to vector<8x1x16xf32>
    "tpu.trace_start"() <{level = 10 : i32, message = "bql,bld->bqd"}> : () -> ()
    %cst_6 = arith.constant dense<0.000000e+00> : vector<8x1x32xf32>
    %14 = tpu.matmul %13, %0, %cst_6 {dimension_numbers = #tpu.dot_dimension_numbers<[2], [1], [1], [2], [0, 0, 0, 1, 1, 2], [0], [0]>} : vector<8x1x16xf32>, vector<8x16x32xf32>, vector<8x1x32xf32> -> vector<8x1x32xf32>
    "tpu.trace_stop"() : () -> ()
    %15 = vector.shape_cast %14 : vector<8x1x32xf32> to vector<8x32xf32>
    %16 = tpu.reciprocal %12 {approx = true} : vector<8x1xf32> -> vector<8x1xf32>
    %17 = vector.broadcast %16 : vector<8x1xf32> to vector<8x32xf32>
    %18 = arith.mulf %15, %17 : vector<8x32xf32>
    %c0_7 = arith.constant 0 : index
    %c0_8 = arith.constant 0 : index
    %19 = vector.load %arg3[%c0_7, %c0_8] : memref<8x32xf32, #tpu.memory_space<vmem>>, vector<8x32xf32>
    tpu.vector_store %arg3[%c0_7, %c0_8], %18 {strides = array<i32>} : memref<8x32xf32, #tpu.memory_space<vmem>>, vector<8x32xf32>,
    return
  }
  func.func @transform_0(%arg0: i32) -> (i32, i32, i32) {
    %c0_i32 = arith.constant 0 : i32
    %c0_i32_0 = arith.constant 0 : i32
    %c0_i32_1 = arith.constant 0 : i32
    return %arg0, %c0_i32, %c0_i32_0 : i32, i32, i32
  }
  func.func @transform_1(%arg0: i32) -> (i32, i32) {
    %c0_i32 = arith.constant 0 : i32
    %c0_i32_0 = arith.constant 0 : i32
    %c0_i32_1 = arith.constant 0 : i32
    return %c0_i32, %c0_i32_0 : i32, i32
  }
  func.func @transform_2(%arg0: i32) -> (i32, i32) {
    %c0_i32 = arith.constant 0 : i32
    %c0_i32_0 = arith.constant 0 : i32
    return %arg0, %c0_i32 : i32, i32
  }
}

</mosaic_0001>

<bundles_post_ra>
// kernel: tpu_custom_call.1
= control target key start
LH: loop header
LB: loop body
LE: loop exit
PB: predicated region body
PF: predicated region fallthrough
CT: control target
= control target key end

     0   :  { %7 = vsyncpa [#allocation3], 0  ;;  %s2140_s0 = inlined_call_operand.hbm [shape: f32[16,16,32], index: 0, kind: input, shape index: {}]   ;;  %s2141_s1 = inlined_call_operand.vmem [shape: f32[1,32], index: 1, kind: input, shape index: {}]   ;;  %s2142_s2 = inlined_call_operand.hbm [shape: f32[16,32], index: 2, kind: output, shape index: {}]  }
   0x1   :  { %9 = vsyncpa [#allocation3 + $0x1], 0 }
   0x2   :  { %10 = vsyncpa [#allocation4], 0 }
   0x3   :  { %12 = vsyncpa [#allocation4 + $0x1], 0  ;;  %s1646_s9 = smov 0   ;;  %s1648_s10 = smov 0  }
   0x4   :  { %s1650_s11 = smov 0   ;;  %s1652_s12 = smov 0  }
   0x5 LB: > { %s1667_s13 = sadd.s32 4294967295, %s1621_s12   ;;  %s1308_s14 = sadd.s32 4294967294, %s1621_s12   ;;  %s1621_s12 = sphi %s1652_s12, %s2155_s12   ;;  %s1617_s11 = sphi %s1650_s11, %s2154_s11   ;;  %s1613_s10 = sphi %s1648_s10, %s2153_s10   ;;  %s1609_s9 = sphi %s1646_s9, %s2152_s9  }
   0x6   : > { %s1671_s15 = sadd.s32 1, %s1621_s12   ;;  %s25_s16 = sadd.s32 1, %s1617_s11 }
   0x7   : > { %s22_s17 = ssub.s32 %s1621_s12, %s1671_s15  ;;  %p32_p0 = scmp.ne.s32.totalorder %s1617_s11, %s1613_s10 }
   0x8   : > { %p23_p1 = scmp.eq.s32.totalorder %s22_s17, 0  ;;  %p33_p2 = scmp.eq.s32.totalorder %s1621_s12, 0 }
   0x9   : > { %p38_p3 = scmp.ne.s32.totalorder %s1613_s10, %s1609_s9  ;;  %p39_p4 = scmp.eq.s32.totalorder %s1667_s13, 0 }
   0xa   : > { %s1683_s18 = scalar_select %p23_p1, %s1617_s11, %s25_s16  }
   0xb   : > { %p1685_p5 = por %p33_p2, %p32_p0  ;;  %p1689_p6 = por %p39_p4, %p38_p3 }
   0xc   : > { %p83_p7 = scmp.eq.s32.totalorder %s1667_s13, 1  ;;  %p89_p8 = scmp.eq.s32.totalorder %s1308_s14, 1 }
   0xd   : > { %p1449_p10 = scmp.lt.s32.totalorder %s1621_s12, 2  ;;  %s112_s23 = sand.u32 1, %s1617_s11  }
   0xe   : > { %p1696_p11 = por %p83_p7, %p32_p0  ;;  %p1700_p12 = por %p89_p8, %p38_p3 }
   0xf   : > { %s1332_s24 = sshll.u32 %s1621_s12, 11  ;;  %s1311_s25 = sshll.u32 %s112_s23, 7 }
  0x10   : > { %s2146_s21 = scalar_select %p1696_p11, 1, 0 }
  0x11   : > { %s2147_s22 = scalar_select %p1700_p12, 1, 0 }
  0x12   : > { %s1709_s28 = scalar_lea.hbm %s2140_s0, %s1332_s24  ;;  %s116_s29 = scalar_lea.vmem [#allocation2], %s1311_s25 }
  0x13   : > { %s124_s30 = sshll.u32 %s116_s29, 4  ;;  %p1713_p13 = pnand %p1449_p10, %p1685_p5  ;;  %s1717_s30 = int_to_ptr.vmem [resolvable:$true] %s124_s30 }
  0x14   : > { %s1719_s4 = scalar_lea.sflag [#allocation3], %s112_s23  ;;  %s1525_s5 = scalar_lea.hbm %s1709_s28, 2048 }
  0x15   : > { %p1526_p0 = scmp.ne.s32.totalorder %s1709_s28, %s1525_s5  ;;  %p1527_p1 = pneg %p1713_p13 }
  0x16   : > { %s1530_s8 = scalar_lea.hbm %s2140_s0, 4096  ;;  %p1531_p4 = scmp.lt.u32.totalorder %s1709_s28, %s2140_s0 }
  0x17   : > { %p1528_p2 = pnand %p1527_p1, %p1526_p0  ;;  %p1532_p5 = scmp.lt.u32.totalorder %s1530_s8, %s1525_s5 }
  0x18   : > { %p1534_p8 = scmp.lt.u32.totalorder %s1525_s5, %s1709_s28 }
  0x19   : > { %p1529_p3 = pneg %p1528_p2  ;;  %p1533_p7 = por %p1532_p5, %p1531_p4 }
  0x1b   : > { %p1535_p10 = por %p1534_p8, %p1533_p7 }
  0x1d   : > { %p1536_p9 = pnand %p1535_p10, %p1529_p3 }
  0x1f   : > { %1539 = shalt.err (!%p1536_p9)
}
  0x20   : > { %s1540_s17 = scalar_lea.vmem %s1717_s30, 2048  ;;  %s1623_s19 = smov [#allocation2]  }
  0x21   : > { %p1541_p0 = scmp.ne.s32.totalorder %s1717_s30, %s1540_s17  ;;  %s1545_s23 = sshll.u32 %s1623_s19, 4  ;;  %s1546_s23 = int_to_ptr.vmem [resolvable:$false] %s1545_s23 }
  0x22   : > { %s1547_s24 = scalar_lea.vmem %s1546_s23, 4096  ;;  %p1548_p11 = scmp.lt.s32.totalorder %s1717_s30, %s1546_s23 }
  0x23   : > { %p1543_p2 = pnand %p1541_p0, %p1527_p1  ;;  %p1549_p4 = scmp.lt.s32.totalorder %s1547_s24, %s1540_s17 }
  0x25   : > { %p1544_p12 = pneg %p1543_p2  ;;  %p1550_p5 = por %p1549_p4, %p1548_p11 }
  0x27   : > { %p1551_p7 = pnand %p1550_p5, %p1544_p12 }
  0x29   : > { %1554 = shalt.err (!%p1551_p7)
}
  0x2a   : > { %s1624_s25 = smov 128   ;;  %s1625_s26 = smov 8  }
  0x2b   : > { %1444 = dma.hbm_to_vmem [thread:$0]  (!%p1713_p13), %s1709_s28, 2048, %s1717_s30, %s1719_s4, %s1624_s25, %s1624_s25, %s1625_s26  }
  0x2c   : > { %p1315_p9 = scmp.ge.s32.totalorder %s1621_s12, 1  ;;  %p132_p1 = scmp.lt.s32.totalorder %s1621_s12, 3 }
  0x2e   : > { %p133_p3 = pnand %p1315_p9, %p132_p1 }
  0x2f   : > { %s1750_s27 = sand.u32 (!%p133_p3), 1, %s1613_s10  }
  0x30   : > { %136 = sbr.rel (%p133_p3) target bundleno = 801 (0x321), region = 28  ;;  %s1316_s29 = sshll.u32 (!%p133_p3), %s1750_s27, 7 }
  0x31   : > { %s139_s5 = scalar_lea.sflag (!%p133_p3), [#allocation3], %s1750_s27  ;;  %s1754_s6 = scalar_lea.vmem (!%p133_p3), [#allocation2], %s1316_s29 }
  0x37   : > { %1600 = dma.done.wait (%p1689_p6), %s139_s5, 2048  }
  0x38   : > { %1602 = vsyncadd (%p1689_p6), %s139_s5, 4294965248  ;;  %v1761_v0 = vld [vmem:[%s1754_s6 + $0x10] sm:$0xff]  ;;  %v1766_v1 = vld [vmem:[%s2141_s1] ss:$0 sm:$0xff]  ;;  %vm203_vm0 = vcmask 261120   ;;  %v268_v59 = vlaneseq  ;;  %vm279_vm1 = vcmask 130112  }
  0x39   : > { %v1769_v2 = vld [vmem:[%s1754_s6] sm:$0xff]  ;;  %v189_v3 = vmul.f32 %v1766_v1, %v1761_v0  ;;  %v1776_v5 = vld [vmem:[%s1754_s6 + $0x18] sm:$0xff]  ;;  %v1779_v6 = vld [vmem:[%s1754_s6 + $0x8] sm:$0xff]  ;;  %vm344_vm2 = vcmask 1041409   ;;  %vm346_vm3 = vcmask 1042434   ;;  %vm348_vm4 = vcmask 1043459  }
  0x3a   : > { %v187_v4 = vmul.f32 %v1766_v1, %v1769_v2  ;;  %v1782_v7 = vld [vmem:[%s1754_s6 + $0x28] sm:$0xff]  ;;  %v190_v8 = vmul.f32 %v1766_v1, %v1776_v5  ;;  %v188_v9 = vmul.f32 %v1766_v1, %v1779_v6  ;;  %v1789_v10 = vld [vmem:[%s1754_s6 + $0x20] sm:$0xff]  ;;  %v1798_v15 = vld [vmem:[%s1754_s6 + $0x38] sm:$0xff]  ;;  %v269_v62 = vand.u32 127, %v268_v59  ;;  %s1317_s20 = sshll.u32 %s1750_s27, 3  ;;  %s1328_s3 = sshll.u32 %s1667_s13, 7 }
  0x3b   : > { %v210_v11 = vsel %vm203_vm0, %v189_v3, 0.0  ;;  %v1420_v13 = vpack.c.bf16 %v1782_v7, %v1789_v10  ;;  %v192_v14 = vmul.f32 %v1766_v1, %v1782_v7  ;;  %v1801_v16 = vld [vmem:[%s1754_s6 + $0x30] sm:$0xff]  ;;  %v191_v19 = vmul.f32 %v1766_v1, %v1789_v10  ;;  %v1810_v21 = vld [vmem:[%s1754_s6 + $0x48] sm:$0xff]  ;;  %v1813_v22 = vld [vmem:[%s1754_s6 + $0x40] sm:$0xff]  ;;  %s162_s4 = scalar_lea.vmem [#allocation5], %s1317_s20  ;;  %s2094_s16 = scalar_lea.hbm %s2142_s2, %s1328_s3 }
  0x3c   : > { %v204_v12 = vsel %vm203_vm0, %v187_v4, 0.0  ;;  %211 = vadd.xlane.f32.xlu1 %v210_v11  ;;  %v213_v17 = vsel %vm203_vm0, %v190_v8, 0.0  ;;  %v207_v18 = vsel %vm203_vm0, %v188_v9, 0.0  ;;  %v1423_v20 = vpack.c.bf16 %v1798_v15, %v1801_v16  ;;  %v1818_v24 = vld [vmem:[%s1754_s6 + $0x58] sm:$0xff]  ;;  %v1821_v25 = vld [vmem:[%s1754_s6 + $0x50] sm:$0xff]  ;;  %v1827_v28 = vld [vmem:[%s1754_s6 + $0x68] sm:$0xff] }
  0x3d   : > { %205 = vadd.xlane.f32.xlu0 %v204_v12  ;;  %v1426_v23 = vpack.c.bf16 %v1810_v21, %v1813_v22  ;;  %v1429_v26 = vpack.c.bf16 %v1818_v24, %v1821_v25  ;;  %v219_v27 = vsel %vm203_vm0, %v192_v14, 0.0  ;;  %v1830_v29 = vld [vmem:[%s1754_s6 + $0x60] sm:$0xff]  ;;  %v216_v30 = vsel %vm203_vm0, %v191_v19, 0.0  ;;  %v1840_v34 = vld [vmem:[%s1754_s6 + $0x78] sm:$0xff]  ;;  %v1843_v35 = vld [vmem:[%s1754_s6 + $0x70] sm:$0xff]  ;;  %s1238_s7 = sshll.u32 %s162_s4, 4  ;;  %s2096_s7 = int_to_ptr.vmem [resolvable:$true] %s1238_s7 }
  0x3e   : > { %v194_v31 = vmul.f32 %v1766_v1, %v1798_v15  ;;  %v193_v32 = vmul.f32 %v1766_v1, %v1801_v16  ;;  %v1432_v33 = vpack.c.bf16 %v1827_v28, %v1830_v29  ;;  %v1435_v36 = vpack.c.bf16 %v1840_v34, %v1843_v35  ;;  %s1225_s17 = scalar_lea.sflag [#allocation4], %s1750_s27  ;;  %s1555_s19 = scalar_lea.vmem %s2096_s7, 128 }
  0x3f   : > { %v196_v39 = vmul.f32 %v1766_v1, %v1810_v21  ;;  %v195_v40 = vmul.f32 %v1766_v1, %v1813_v22  ;;  %v198_v43 = vmul.f32 %v1766_v1, %v1818_v24  ;;  %v197_v44 = vmul.f32 %v1766_v1, %v1821_v25  ;;  %p1556_p6 = scmp.ne.s32.totalorder %s2096_s7, %s1555_s19  ;;  %p2149_p11 = scmp.ne.s32.totalorder %s2146_s21, 0 }
  0x40   : > { %214 = vadd.xlane.f32.xlu1 %v213_v17  ;;  %v225_v37 = vsel %vm203_vm0, %v194_v31, 0.0  ;;  %v222_v38 = vsel %vm203_vm0, %v193_v32, 0.0  ;;  %v200_v47 = vmul.f32 %v1766_v1, %v1827_v28  ;;  %v199_v48 = vmul.f32 %v1766_v1, %v1830_v29  ;;  %s1630_s13 = smov [#allocation5]  }
  0x41   : > { %208 = vadd.xlane.f32.xlu0 %v207_v18  ;;  %v231_v41 = vsel %vm203_vm0, %v196_v39, 0.0  ;;  %v228_v42 = vsel %vm203_vm0, %v195_v40, 0.0  ;;  %v237_v45 = vsel %vm203_vm0, %v198_v43, 0.0  ;;  %v234_v46 = vsel %vm203_vm0, %v197_v44, 0.0  ;;  %p1557_p12 = pnand %p1556_p6, %p2149_p11  ;;  %s1559_s23 = sshll.u32 %s1630_s13, 4  ;;  %s1560_s23 = int_to_ptr.vmem [resolvable:$false] %s1559_s23 }
  0x42   : > { %v243_v49 = vsel %vm203_vm0, %v200_v47, 0.0  ;;  %v240_v50 = vsel %vm203_vm0, %v199_v48, 0.0  ;;  %v202_v51 = vmul.f32 %v1766_v1, %v1840_v34  ;;  %v201_v52 = vmul.f32 %v1766_v1, %v1843_v35  ;;  %s1561_s24 = scalar_lea.vmem %s1560_s23, 256  ;;  %p1562_p8 = scmp.lt.s32.totalorder %s2096_s7, %s1560_s23 }
  0x43   : > { %v274_v63 = vadd.s32 4294967288, %v269_v62  ;;  %v1889_v4 = vshrl.u32 %v268_v59, 7  ;;  %vm350_vm5 = vcmask 1044484   ;;  %vm352_vm6 = vcmask 1045509   ;;  %p1558_p13 = pneg %p1557_p12  ;;  %p1563_p10 = scmp.lt.s32.totalorder %s1561_s24, %s1555_s19 }
  0x44   : > { %220 = vadd.xlane.f32.xlu1 %v219_v27  ;;  %v249_v53 = vsel %vm203_vm0, %v202_v51, 0.0  ;;  %v246_v54 = vsel %vm203_vm0, %v201_v52, 0.0  ;;  %vm354_vm7 = vcmask 1046534   ;;  %vm356_vm8 = vcmask 1047559  }
  0x45   : > { %217 = vadd.xlane.f32.xlu0 %v216_v30  ;;  %v1892_v8 = vsub.s32 %v274_v63, %v1889_v4  ;;  %v1899_v12 = vsub.s32 %v269_v62, %v1889_v4  ;;  %vm359_vm9 = vcmask 130048   ;;  %vm1628_vm10 = vmmov 0   ;;  %p1564_p0 = por %p1563_p10, %p1562_p8 }
  0x47   : > { %p1565_p2 = pnand %p1564_p0, %p1558_p13 }
  0x48   : > { %226 = vadd.xlane.f32.xlu1 %v225_v37 }
  0x49   : > { %223 = vadd.xlane.f32.xlu0 %v222_v38 }
  0x4c   : > { %232 = vadd.xlane.f32.xlu1 %v231_v41 }
  0x4d   : > { %229 = vadd.xlane.f32.xlu0 %v228_v42 }
  0x50   : > { %238 = vadd.xlane.f32.xlu1 %v237_v45 }
  0x51   : > { %235 = vadd.xlane.f32.xlu0 %v234_v46 }
  0x54   : > { %244 = vadd.xlane.f32.xlu1 %v243_v49 }
  0x55   : > { %241 = vadd.xlane.f32.xlu0 %v240_v50 }
  0x58   : > { %250 = vadd.xlane.f32.xlu1 %v249_v53 }
  0x59   : > { %247 = vadd.xlane.f32.xlu0 %v246_v54 }
  0xc9   : > { %v1873_v55 = vpop.xlane.xlu1 %211 }
  0xca   : > { %v1875_v56 = vpop.xlane.xlu0 %205  ;;  %v284_v31 = vrot.slane %v1873_v55, %v1899_v12 }
  0xcb   : > { %v273_v32 = vrot.slane %v1875_v56, %v1899_v12 }
  0xcd   : > { %v1877_v57 = vpop.xlane.xlu1 %214 }
  0xce   : > { %v1879_v58 = vpop.xlane.xlu0 %208  ;;  %v288_v14 = vrot.slane %v1877_v57, %v1892_v8 }
  0xcf   : > { %v278_v17 = vrot.slane %v1879_v58, %v1892_v8 }
  0xd0   : > { %v289_v41 = vsel %vm279_vm1, %v288_v14, %v284_v31 }
  0xd1   : > { %v1881_v60 = vpop.xlane.xlu1 %220  ;;  %v280_v42 = vsel %vm279_vm1, %v278_v17, %v273_v32 }
  0xd2   : > { %v1883_v61 = vpop.xlane.xlu0 %217  ;;  %v297_v18 = vrot.slane %v1881_v60, %v1892_v8  ;;  %v345_v51 = vsel %vm344_vm2, %v289_v41, %v280_v42  ;;  %v1627_v41 = vmov 0.0|0.0   ;;  %v366_v42 = vsub.s32 0, %v1889_v4 }
  0xd3   : > { %v293_v19 = vrot.slane %v1883_v61, %v1899_v12  ;;  %1413 = vmatprep.subr.bf16.mxu0 %v1627_v41  ;;  %1416 = vmatprep.subr.bf16.mxu1 %v1627_v41 }
  0xd5   : > { %v1885_v1 = vpop.xlane.xlu1 %226  ;;  %v298_v45 = vsel %vm279_vm1, %v297_v18, %v293_v19 }
  0xd6   : > { %v1887_v3 = vpop.xlane.xlu0 %223  ;;  %v306_v37 = vrot.slane %v1885_v1, %v1892_v8  ;;  %v347_v53 = vsel %vm346_vm3, %v298_v45, %v345_v51 }
  0xd7   : > { %v302_v38 = vrot.slane %v1887_v3, %v1899_v12 }
  0xd9   : > { %v1894_v9 = vpop.xlane.xlu1 %232  ;;  %v307_v48 = vsel %vm279_vm1, %v306_v37, %v302_v38 }
  0xda   : > { %v1896_v11 = vpop.xlane.xlu0 %229  ;;  %v315_v39 = vrot.slane %v1894_v9, %v1892_v8  ;;  %v349_v59 = vsel %vm348_vm4, %v307_v48, %v347_v53 }
  0xdb   : > { %v311_v40 = vrot.slane %v1896_v11, %v1899_v12 }
  0xdd   : > { %v1909_v27 = vpop.xlane.xlu1 %238  ;;  %v316_v52 = vsel %vm279_vm1, %v315_v39, %v311_v40  ;;  %v1626_v40 = vmov 0  }
  0xde   : > { %v1911_v30 = vpop.xlane.xlu0 %235  ;;  %v324_v43 = vrot.slane %v1909_v27, %v1892_v8  ;;  %v351_v19 = vsel %vm350_vm5, %v316_v52, %v349_v59  ;;  %1490 = vset.pattern.permute.xlu0 %v1626_v40  ;;  %1489 = vset.pattern.permute.xlu1 %v1626_v40  ;;  %v374_v52 = vsub.s32 2, %v1889_v4 }
  0xdf   : > { %v320_v44 = vrot.slane %v1911_v30, %v1899_v12 }
  0xe1   : > { %v1932_v46 = vpop.xlane.xlu1 %244  ;;  %v325_v54 = vsel %vm279_vm1, %v324_v43, %v320_v44  ;;  %v370_v43 = vsub.s32 1, %v1889_v4 }
  0xe2   : > { %v1934_v47 = vpop.xlane.xlu0 %241  ;;  %v333_v49 = vrot.slane %v1932_v46, %v1892_v8  ;;  %v353_v31 = vsel %vm352_vm6, %v325_v54, %v351_v19  ;;  %v390_v54 = vsub.s32 6, %v1889_v4 }
  0xe3   : > { %v329_v50 = vrot.slane %v1934_v47, %v1899_v12 }
  0xe5   : > { %v1946_v62 = vpop.xlane.xlu1 %250  ;;  %v334_v14 = vsel %vm279_vm1, %v333_v49, %v329_v50  ;;  %v386_v49 = vsub.s32 5, %v1889_v4 }
  0xe6   : > { %v1948_v63 = vpop.xlane.xlu0 %247  ;;  %v342_v17 = vrot.slane %v1946_v62, %v1892_v8  ;;  %v355_v37 = vsel %vm354_vm7, %v334_v14, %v353_v31 }
  0xe7   : > { %v338_v18 = vrot.slane %v1948_v63, %v1899_v12 }
  0xe9   : > { %v343_v32 = vsel %vm279_vm1, %v342_v17, %v338_v18 }
  0xea   : > { %v357_v38 = vsel %vm356_vm8, %v343_v32, %v355_v37 }
  0xeb   : > { %v360_v39 = vsel %vm359_vm9, %v357_v38, -inf }
  0xec   : > { %361 = vmax.xlane.f32.xlu0 %v360_v39 }
 0x179   : > { %v362_v44 = vpop.xlane.xlu0 %361 }
 0x17a   : > { %v367_v45 = vrot.slane %v362_v44, %v366_v42  ;;  %v371_v48 = vrot.slane %v362_v44, %v370_v43  ;;  %v1971_v59 = vrot.slane %v362_v44, %v386_v49  ;;  %v375_v18 = vrot.slane %v362_v44, %v374_v52 }
 0x17b   : > { %v1975_v32 = vrot.slane %v362_v44, %v390_v54 }
 0x17c   : > { %v404_v50 = vsub.f32 %v1875_v56, %v367_v45  ;;  %v405_v51 = vsub.f32 %v1879_v58, %v367_v45  ;;  %v406_v53 = vsub.f32 %v1873_v55, %v371_v48  ;;  %v407_v19 = vsub.f32 %v1877_v57, %v371_v48 }
 0x17d   : > { %v394_v56 = vsub.s32 7, %v1889_v4  ;;  %v414_v58 = vsub.f32 %v1911_v30, %v1971_v59  ;;  %v378_v55 = vsub.s32 3, %v1889_v4  ;;  %v408_v37 = vsub.f32 %v1883_v61, %v375_v18 }
 0x17e   : > { %v420_v14 = vmul.f32 1.442695, %v404_v50  ;;  %v422_v17 = vmul.f32 1.442695, %v405_v51  ;;  %v424_v31 = vmul.f32 1.442695, %v406_v53  ;;  %v416_v57 = vsub.f32 %v1934_v47, %v1975_v32 }
 0x17f   : > { %v426_v38 = vmul.f32 1.442695, %v407_v19  ;;  %v1981_v39 = vrot.slane %v362_v44, %v394_v56  ;;  %v440_v40 = vmul.f32 1.442695, %v414_v58  ;;  %v379_v42 = vrot.slane %v362_v44, %v378_v55 }
 0x180   : > { %1491 = vpow2.f32 %v420_v14  ;;  %v409_v43 = vsub.f32 %v1881_v60, %v375_v18  ;;  %v428_v45 = vmul.f32 1.442695, %v408_v37  ;;  %v444_v49 = vmul.f32 1.442695, %v416_v57 }
 0x181   : > { %1493 = vpow2.f32 %v422_v17  ;;  %v418_v30 = vsub.f32 %v1948_v63, %v1981_v39  ;;  %v382_v50 = vsub.s32 4, %v1889_v4  ;;  %v410_v51 = vsub.f32 %v1887_v3, %v379_v42 }
 0x182   : > { %1495 = vpow2.f32 %v424_v31  ;;  %v430_v52 = vmul.f32 1.442695, %v409_v43  ;;  %v1414_v60 = vpack.c.bf16 %v1779_v6, %v1769_v2  ;;  %v1629_v47 = vmov 0.0  }
 0x183   : > { %1497 = vpow2.f32 %v426_v38  ;;  %1361 = vmatprep.mubr.msk.f32.mxu0 %vm1628_vm10, %v1629_v47  ;;  %1368 = vmatprep.mubr.msk.f32.mxu1 %vm1628_vm10, %v1629_v47  ;;  %v448_v4 = vmul.f32 1.442695, %v418_v30  ;;  %v383_v3 = vrot.slane %v362_v44, %v382_v50  ;;  %v411_v53 = vsub.f32 %v1885_v1, %v379_v42 }
 0x184   : > { %1499 = vpow2.f32 %v440_v40  ;;  %1415 = vmatpush3.bf16.msra.mxu0 %v1414_v60  ;;  %v432_v2 = vmul.f32 1.442695, %v410_v51  ;;  %v1417_v1 = vpack.c.bf16 %v1776_v5, %v1761_v0  ;;  %v419_v5 = vsub.f32 %v1946_v62, %v1981_v39 }
 0x185   : > { %1501 = vpow2.f32 %v428_v45  ;;  %1419 = vmatprep.subr.bf16.mxu0 %v1627_v41  ;;  %v412_v14 = vsub.f32 %v1896_v11, %v383_v3  ;;  %v434_v17 = vmul.f32 1.442695, %v411_v53  ;;  %v413_v31 = vsub.f32 %v1894_v9, %v383_v3 }
 0x186   : > { %1503 = vpow2.f32 %v444_v49  ;;  %1418 = vmatpush3.bf16.msra.mxu1 %v1417_v1  ;;  %v415_v11 = vsub.f32 %v1909_v27, %v1971_v59  ;;  %v417_v9 = vsub.f32 %v1932_v46, %v1975_v32  ;;  %v450_v59 = vmul.f32 1.442695, %v419_v5 }
 0x187   : > { %1505 = vpow2.f32 %v430_v52  ;;  %v436_v44 = vmul.f32 1.442695, %v412_v14  ;;  %v438_v55 = vmul.f32 1.442695, %v413_v31  ;;  %1422 = vmatprep.subr.bf16.mxu1 %v1627_v41 }
 0x188   : > { %1507 = vpow2.f32 %v448_v4  ;;  %v442_v38 = vmul.f32 1.442695, %v415_v11  ;;  %v446_v57 = vmul.f32 1.442695, %v417_v9 }
 0x189   : > { %1509 = vpow2.f32 %v432_v2 }
 0x18a   : > { %v1492_v48 = vpop.eup %1491  ;;  %1511 = vpow2.f32 %v434_v17 }
 0x18b   : > { %v1494_v61 = vpop.eup %1493  ;;  %469 = vperm.xlu1 %1489, %v1492_v48   ;;  %1513 = vpow2.f32 %v436_v44 }
 0x18c   : > { %472 = vperm.xlu0 %1490, %v1494_v61   ;;  %v1496_v63 = vpop.eup %1495  ;;  %1515 = vpow2.f32 %v438_v55 }
 0x18d   : > { %v1498_v6 = vpop.eup %1497  ;;  %1517 = vpow2.f32 %v442_v38 }
 0x18e   : > { %v1500_v54 = vpop.eup %1499  ;;  %1519 = vpow2.f32 %v446_v57 }
 0x18f   : > { %475 = vperm.xlu1 %1489, %v1496_v63   ;;  %v1502_v18 = vpop.eup %1501  ;;  %1521 = vpow2.f32 %v450_v59 }
 0x190   : > { %499 = vperm.xlu0 %1490, %v1500_v54   ;;  %v1504_v19 = vpop.eup %1503 }
 0x191   : > { %v1506_v56 = vpop.eup %1505 }
 0x192   : > { %v1508_v58 = vpop.eup %1507 }
 0x193   : > { %478 = vperm.xlu1 %1489, %v1498_v6   ;;  %v1510_v37 = vpop.eup %1509 }
 0x194   : > { %505 = vperm.xlu0 %1490, %v1504_v19   ;;  %v1512_v0 = vpop.eup %1511 }
 0x195   : > { %v1514_v27 = vpop.eup %1513 }
 0x196   : > { %v1516_v40 = vpop.eup %1515 }
 0x197   : > { %481 = vperm.xlu1 %1489, %v1502_v18   ;;  %v1518_v42 = vpop.eup %1517 }
 0x198   : > { %511 = vperm.xlu0 %1490, %v1508_v58   ;;  %v1520_v43 = vpop.eup %1519 }
 0x199   : > { %v1522_v46 = vpop.eup %1521 }
 0x19b   : > { %484 = vperm.xlu1 %1489, %v1506_v56  }
 0x19f   : > { %487 = vperm.xlu1 %1489, %v1510_v37  }
 0x1a3   : > { %490 = vperm.xlu1 %1489, %v1512_v0  }
 0x1a7   : > { %493 = vperm.xlu1 %1489, %v1514_v27  }
 0x1ab   : > { %496 = vperm.xlu1 %1489, %v1516_v40  }
 0x1af   : > { %502 = vperm.xlu1 %1489, %v1518_v42  }
 0x1b3   : > { %508 = vperm.xlu1 %1489, %v1520_v43  }
 0x1b7   : > { %514 = vperm.xlu1 %1489, %v1522_v46  }
 0x20a   : > { %v470_v32 = vpop.permute.xlu1 %469 }
 0x20b   : > { %v473_v45 = vpop.permute.xlu0 %472  ;;  %v519_v48 = vrot.slane %v470_v32, %v1899_v12 }
 0x20c   : > { %v523_v62 = vrot.slane %v473_v45, %v1892_v8 }
 0x20e   : > { %v524_v39 = vsel %vm279_vm1, %v523_v62, %v519_v48  ;;  %v476_v30 = vpop.permute.xlu1 %475 }
 0x20f   : > { %1362 = vmatmul.mubr.msk.f32.vlgmr.msra.gmra.mrb[0].mxu0 %vm359_vm9, %v524_v39  ;;  %v528_v61 = vrot.slane %v476_v30, %v1899_v12  ;;  %v500_v21 = vpop.permute.xlu0 %499 }
 0x210   : > { %1421 = vmatpush3.bf16.msra.mxu0 %v1420_v13  ;;  %1375 = vmatprep.mubr.msk.f32.mxu0 %vm1628_vm10, %v1629_v47  ;;  %v564_v24 = vrot.slane %v500_v21, %v1899_v12 }
 0x211   : > { %1425 = vmatprep.subr.bf16.mxu0 %v1627_v41 }
 0x212   : > { %v479_v49 = vpop.permute.xlu1 %478 }
 0x213   : > { %v532_v50 = vrot.slane %v479_v49, %v1892_v8  ;;  %v506_v6 = vpop.permute.xlu0 %505 }
 0x214   : > { %v573_v14 = vrot.slane %v506_v6, %v1899_v12 }
 0x215   : > { %v533_v51 = vsel %vm279_vm1, %v532_v50, %v528_v61 }
 0x216   : > { %1369 = vmatmul.mubr.msk.f32.vlgmr.msra.gmra.mrb[0].mxu1 %vm359_vm9, %v533_v51  ;;  %v482_v52 = vpop.permute.xlu1 %481  ;;  %v588_v29 = vsel %vm344_vm2, %v533_v51, %v524_v39 }
 0x217   : > { %1424 = vmatpush3.bf16.msra.mxu1 %v1423_v20  ;;  %1382 = vmatprep.mubr.msk.f32.mxu1 %vm1628_vm10, %v1629_v47  ;;  %v537_v10 = vrot.slane %v482_v52, %v1899_v12  ;;  %v512_v28 = vpop.permute.xlu0 %511 }
 0x218   : > { %1428 = vmatprep.subr.bf16.mxu1 %v1627_v41  ;;  %v582_v44 = vrot.slane %v512_v28, %v1899_v12 }
 0x21a   : > { %v485_v7 = vpop.permute.xlu1 %484 }
 0x21b   : > { %v541_v13 = vrot.slane %v485_v7, %v1892_v8 }
 0x21d   : > { %v542_v60 = vsel %vm279_vm1, %v541_v13, %v537_v10 }
 0x21e   : > { %1376 = vmatmul.mubr.msk.f32.vlgmr.msra.gmra.mrb[2].mxu0 %vm359_vm9, %v542_v60  ;;  %v488_v63 = vpop.permute.xlu1 %487 }
 0x21f   : > { %1427 = vmatpush3.bf16.msra.mxu0 %v1426_v23  ;;  %1389 = vmatprep.mubr.msk.f32.mxu0 %vm1628_vm10, %v1629_v47  ;;  %v546_v16 = vrot.slane %v488_v63, %v1899_v12 }
 0x220   : > { %1431 = vmatprep.subr.bf16.mxu0 %v1627_v41 }
 0x222   : > { %v491_v15 = vpop.permute.xlu1 %490 }
 0x223   : > { %v550_v20 = vrot.slane %v491_v15, %v1892_v8 }
 0x225   : > { %v551_v4 = vsel %vm279_vm1, %v550_v20, %v546_v16 }
 0x226   : > { %1383 = vmatmul.mubr.msk.f32.vlgmr.msra.gmra.mrb[2].mxu1 %vm359_vm9, %v551_v4  ;;  %v494_v3 = vpop.permute.xlu1 %493 }
 0x227   : > { %1430 = vmatpush3.bf16.msra.mxu1 %v1429_v26  ;;  %1396 = vmatprep.mubr.msk.f32.mxu1 %vm1628_vm10, %v1629_v47  ;;  %v555_v23 = vrot.slane %v494_v3, %v1899_v12 }
 0x228   : > { %1434 = vmatprep.subr.bf16.mxu1 %v1627_v41 }
 0x22a   : > { %v497_v22 = vpop.permute.xlu1 %496 }
 0x22b   : > { %v559_v53 = vrot.slane %v497_v22, %v1892_v8 }
 0x22d   : > { %v560_v2 = vsel %vm279_vm1, %v559_v53, %v555_v23 }
 0x22e   : > { %1390 = vmatmul.mubr.msk.f32.vlgmr.msra.gmra.mrb[4].mxu0 %vm359_vm9, %v560_v2  ;;  %v503_v54 = vpop.permute.xlu1 %502 }
 0x22f   : > { %v568_v25 = vrot.slane %v503_v54, %v1892_v8  ;;  %1433 = vmatpush3.bf16.msra.mxu0 %v1432_v33  ;;  %1403 = vmatprep.mubr.msk.f32.mxu0 %vm1628_vm10, %v1629_v47  ;;  %v589_v33 = vsel %vm346_vm3, %v542_v60, %v588_v29 }
 0x230   : > { %v590_v19 = vsel %vm348_vm4, %v551_v4, %v589_v33 }
 0x231   : > { %v569_v26 = vsel %vm279_vm1, %v568_v25, %v564_v24  ;;  %v591_v34 = vsel %vm350_vm5, %v560_v2, %v590_v19 }
 0x232   : > { %1397 = vmatmul.mubr.msk.f32.vlgmr.msra.gmra.mrb[4].mxu1 %vm359_vm9, %v569_v26  ;;  %v509_v41 = vpop.permute.xlu1 %508 }
 0x233   : > { %v577_v17 = vrot.slane %v509_v41, %v1892_v8  ;;  %1436 = vmatpush3.bf16.msra.mxu1 %v1435_v36  ;;  %1410 = vmatprep.mubr.msk.f32.mxu1 %vm1628_vm10, %v1629_v47  ;;  %v592_v36 = vsel %vm352_vm6, %v569_v26, %v591_v34 }
 0x235   : > { %v578_v18 = vsel %vm279_vm1, %v577_v17, %v573_v14 }
 0x236   : > { %1404 = vmatmul.mubr.msk.f32.vlgmr.msra.gmra.mrb[6].mxu0 %vm359_vm9, %v578_v18  ;;  %v515_v31 = vpop.permute.xlu1 %514  ;;  %v593_v1 = vsel %vm354_vm7, %v578_v18, %v592_v36 }
 0x237   : > { %v586_v35 = vrot.slane %v515_v31, %v1892_v8 }
 0x239   : > { %v587_v47 = vsel %vm279_vm1, %v586_v35, %v582_v44 }
 0x23a   : > { %1411 = vmatmul.mubr.msk.f32.vlgmr.msra.gmra.mrb[6].mxu1 %vm359_vm9, %v587_v47  ;;  %v594_v56 = vsel %vm356_vm8, %v587_v47, %v593_v1 }
 0x23b   : > { %v596_v58 = vsel %vm359_vm9, %v594_v56, 0.0 }
 0x23c   : > { %597 = vadd.xlane.f32.xlu0 %v596_v58 }
 0x2c9   : > { %v598_v11 = vpop.xlane.xlu0 %597 }
 0x2ca   : > { %1523 = vrcp.f32 %v598_v11 }
 0x2d4   : > { %v1524_v37 = vpop.eup %1523 }
 0x2d5   : > { %v1177_v9 = vrot.slane %v1524_v37, 1  ;;  %v1178_v59 = vrot.slane %v1524_v37, 2  ;;  %v1179_v45 = vrot.slane %v1524_v37, 3  ;;  %v1180_v61 = vrot.slane %v1524_v37, 4 }
 0x2d6   : > { %v1181_v10 = vrot.slane %v1524_v37, 5  ;;  %v1182_v20 = vrot.slane %v1524_v37, 6  ;;  %v1183_v53 = vrot.slane %v1524_v37, 7 }
 0x2e2   : > { %v667_v12 = vpop.f32.mrb[0].mxu0 }
 0x2e3   : > { %v1363_v55 = vpop.f32.mrb[1].mxu0  ;;  %v1192_v5 = vmul.f32 %v1524_v37, %v667_v12 }
 0x2e9   : > { %v739_v8 = vpop.f32.mrb[0].mxu1 }
 0x2ea   : > { %v1193_v38 = vmul.f32 %v1177_v9, %v739_v8  ;;  %v1370_v0 = vpop.f32.mrb[1].mxu1 }
 0x2ec   : > { %v1208_v57 = vrot.slane %v1193_v38, 7 }
 0x2ee   : > { %v1209_v27 = vsel %vm344_vm2, %v1208_v57, %v1192_v5 }
 0x2f1   : > { %v811_v40 = vpop.f32.mrb[2].mxu0 }
 0x2f2   : > { %v1194_v42 = vmul.f32 %v1178_v59, %v811_v40  ;;  %v1377_v43 = vpop.f32.mrb[3].mxu0 }
 0x2f4   : > { %v1210_v46 = vrot.slane %v1194_v42, 6 }
 0x2f6   : > { %v1211_v32 = vsel %vm346_vm3, %v1210_v46, %v1209_v27 }
 0x2f9   : > { %v883_v48 = vpop.f32.mrb[2].mxu1 }
 0x2fa   : > { %v1195_v62 = vmul.f32 %v1179_v45, %v883_v48  ;;  %v1384_v39 = vpop.f32.mrb[3].mxu1 }
 0x2fc   : > { %v1212_v30 = vrot.slane %v1195_v62, 5 }
 0x2fe   : > { %v1213_v49 = vsel %vm348_vm4, %v1212_v30, %v1211_v32 }
 0x301   : > { %v955_v50 = vpop.f32.mrb[4].mxu0 }
 0x302   : > { %v1196_v51 = vmul.f32 %v1180_v61, %v955_v50  ;;  %v1391_v52 = vpop.f32.mrb[5].mxu0 }
 0x304   : > { %v1214_v7 = vrot.slane %v1196_v51, 4 }
 0x305   : > { %v1027_v13 = vpop.f32.mrb[4].mxu1 }
 0x306   : > { %v1215_v60 = vsel %vm350_vm5, %v1214_v7, %v1213_v49  ;;  %v1197_v63 = vmul.f32 %v1181_v10, %v1027_v13  ;;  %v1398_v15 = vpop.f32.mrb[5].mxu1 }
 0x308   : > { %v1216_v16 = vrot.slane %v1197_v63, 3 }
 0x309   : > { %v1099_v4 = vpop.f32.mrb[6].mxu0 }
 0x30a   : > { %v1217_v3 = vsel %vm352_vm6, %v1216_v16, %v1215_v60  ;;  %v1198_v21 = vmul.f32 %v1182_v20, %v1099_v4  ;;  %v1405_v22 = vpop.f32.mrb[7].mxu0 }
 0x30c   : > { %v1218_v23 = vrot.slane %v1198_v21, 2 }
 0x30d   : > { %v1171_v2 = vpop.f32.mrb[6].mxu1 }
 0x30e   : > { %v1219_v6 = vsel %vm354_vm7, %v1218_v23, %v1217_v3  ;;  %v1199_v54 = vmul.f32 %v1183_v53, %v1171_v2  ;;  %v1412_v24 = vpop.f32.mrb[7].mxu1 }
 0x310   : > { %v1220_v25 = vrot.slane %v1199_v54, 1 }
 0x312   : > { %v1221_v26 = vsel %vm356_vm8, %v1220_v25, %v1219_v6 }
 0x313   : > { %1223 = vst.msk [vmem:[%s162_s4] sm:$0xff] %vm203_vm0, %v1221_v26 }
 0x314   : > { %1568 = shalt.err (!%p1565_p2)
}
 0x315   : > { %s1569_s25 = scalar_lea.hbm %s2094_s16, 128  ;;  %s1573_s29 = scalar_lea.hbm %s2142_s2, 256 }
 0x316   : > { %p1570_p4 = scmp.ne.s32.totalorder %s2094_s16, %s1569_s25  ;;  %p1574_p9 = scmp.lt.u32.totalorder %s2094_s16, %s2142_s2 }
 0x317   : > { %p1575_p1 = scmp.lt.u32.totalorder %s1573_s29, %s1569_s25  ;;  %p1577_p6 = scmp.lt.u32.totalorder %s1569_s25, %s2094_s16 }
 0x318   : > { %p1571_p5 = pnand %p1570_p4, %p2149_p11 }
 0x319   : > { %p1576_p3 = por %p1575_p1, %p1574_p9 }
 0x31a   : > { %p1572_p7 = pneg %p1571_p5 }
 0x31b   : > { %p1578_p12 = por %p1577_p6, %p1576_p3 }
 0x31d   : > { %p1579_p13 = pnand %p1578_p12, %p1572_p7 }
 0x31f   : > { %1582 = shalt.err (!%p1579_p13)
}
 0x320   : > { %1439 = dma.vmem_to_hbm [thread:$0]  (%p2149_p11), %s2096_s7, 128, %s2094_s16, %s1225_s17  }
 0x321 PF: > { %s1250_s28 = sand.u32 1, %s1609_s9   ;;  %p2150_p8 = scmp.ne.s32.totalorder %s2147_s22, 0 }
 0x322   : > { %p2151_p10 = scmp.ge.s32.totalorder %s1621_s12, 2  ;;  %s1251_s30 = scalar_lea.sflag [#allocation4], %s1250_s28 }
 0x324   : > { %p1446_p0 = pnand %p2151_p10, %p2150_p8 }
 0x326   : > { %1604 = dma.done.wait (!%p1446_p0), %s1251_s30, 128  }
 0x327   : > { %1606 = vsyncadd (!%p1446_p0), %s1251_s30, 4294967168  ;;  %p15_p2 = scmp.ge.s32.totalorder %s1671_s15, 4   ;;  %s2152_s9 = smov %s1613_s10 }
 0x328   : > { %s2153_s10 = smov %s1617_s11  ;;  %s2154_s11 = smov %s1683_s18 }
 0x329   : > { %s2155_s12 = smov %s1671_s15  ;;  %17 = sbr.rel (!%p15_p2) target bundleno = 5 (0x5), region = 73 }
 0x330   :  { %1256 = vsyncpa [#allocation3], 1 }
 0x331   :  { %1258 = vsyncpa [#allocation3 + $0x1], 1 }
 0x332   :  { %1259 = vsyncpa [#allocation4], 1 }
 0x333   :  { %1261 = vsyncpa [#allocation4 + $0x1], 1 }

</bundles_post_ra>
